<compile_context>
chip_gen: v6e
topology: v6e:2x2x1
jax: 0.10.0
libtpu: 0.0.40
codegen_flags: <defaults>
</compile_context>

<pallas_src>
import jax
import jax.numpy as jnp
from jax import lax
from jax.experimental import pallas as pl
from jax.experimental.pallas import tpu as pltpu


def cam_kernel(gamma_ref, x_ref, o_ref):
    """gamma_ref: SMEM f32[1]   (the learnable scalar gamma)
       x_ref:     VMEM (1, C, HW)  one batch element, spatially flattened
       o_ref:     VMEM (1, C, HW)
    """
    xv = x_ref[0].astype(jnp.float32)                       # (C, HW)

    # energy[i, j] = sum_k x[i, k] * x[j, k]  -- contract the lane (HW) axis of
    # both operands on the MXU; no explicit transpose is materialized.
    energy = lax.dot_general(
        xv, xv,
        dimension_numbers=(((1,), (1,)), ((), ())),
        preferred_element_type=jnp.float32)                 # (C, C)

    # energy_new = rowmax(energy) - energy, then stable softmax along last axis.
    row_max = jnp.max(energy, axis=-1, keepdims=True)
    energy_new = row_max - energy
    m = jnp.max(energy_new, axis=-1, keepdims=True)
    e = jnp.exp(energy_new - m)                             # EUP
    attention = e / jnp.sum(e, axis=-1, keepdims=True)      # (C, C)

    # out = attention @ x  (MXU), then residual: gamma * out + x.
    out = jnp.dot(attention, xv, preferred_element_type=jnp.float32)  # (C, HW)
    o_ref[0] = (gamma_ref[0] * out + xv).astype(o_ref.dtype)


def cam_module(x, gamma):
    """x: (N, C, H, W); gamma: f32[1]. Returns gamma * (attention @ x) + x."""
    N, C, H, W = x.shape
    HW = H * W
    # Lane-dense layout: last dim becomes H*W (multiple of 128 for the test shape).
    xf = x.reshape(N, C, HW)

    out = pl.pallas_call(
        cam_kernel,
        out_shape=jax.ShapeDtypeStruct((N, C, HW), x.dtype),
        grid_spec=pltpu.PrefetchScalarGridSpec(
            num_scalar_prefetch=0,
            grid=(N,),
            in_specs=[
                pl.BlockSpec(memory_space=pltpu.MemorySpace.SMEM),   # gamma scalar
                pl.BlockSpec((1, C, HW), lambda n: (n, 0, 0)),       # x (one image)
            ],
            out_specs=pl.BlockSpec((1, C, HW), lambda n: (n, 0, 0)),
        ),
        compiler_params=pltpu.CompilerParams(
            dimension_semantics=("parallel",),   # batch axis -> both TCs on v7x
        ),
    )(gamma, xf)
    return out.reshape(N, C, H, W)
    # TODO(synk): for production shapes where C*H*W per image exceeds the VMEM
    # budget (esp. v7x's 64 MiB), add an HW-tiled two-pass variant (energy pass
    # + apply pass) instead of one full image per grid step.


def reference_forward(x, gamma):
    """Pure-JAX reference of the PyTorch CAM_Module forward."""
    N, C, H, W = x.shape
    q = x.reshape(N, C, H * W)
    energy = jnp.einsum('ncd,nkd->nck', q, q, precision=lax.Precision.HIGHEST)
    energy_new = jnp.max(energy, axis=-1, keepdims=True) - energy
    attention = jax.nn.softmax(energy_new, axis=-1)
    out = jnp.einsum('nck,nkd->ncd', attention, q,
                     precision=lax.Precision.HIGHEST)
    return gamma.reshape(1, 1, 1, 1) * out.reshape(N, C, H, W) + x


if __name__ == "__main__":
    key = jax.random.PRNGKey(0)
    N, C, H, W = 2, 4, 16, 16
    x = 0.25 * jax.random.normal(key, (N, C, H, W), dtype=jnp.float32)

    # PyTorch initializes gamma to 0 (output == x); use a nonzero value so the
    # attention path is actually exercised by the correctness check.
    gamma = jnp.array([0.5], dtype=jnp.float32)

    out = cam_module(x, gamma)
    out = jax.block_until_ready(out)

    ref = reference_forward(x, gamma)
    assert out.shape == ref.shape == (N, C, H, W)
    err = jnp.max(jnp.abs(out - ref))
    assert jnp.allclose(out, ref, atol=2e-4, rtol=2e-4), f"max abs err {err}"

    print("KERNEL_OK")
</pallas_src>

<mosaic_0001>
module attributes {stable_mosaic.version = 11 : i64} {
  func.func @cam_kernel(%arg0: i32, %arg1: memref<1xf32, #tpu.memory_space<smem>>, %arg2: memref<1x4x256xf32, #tpu.memory_space<vmem>>, %arg3: memref<1x4x256xf32, #tpu.memory_space<vmem>>) attributes {dimension_semantics = [#tpu.dimension_semantics<parallel>], iteration_bounds = array<i64: 2>, scalar_prefetch = 0 : i64, scratch_operands = 0 : i64, tpu.core_type = #tpu.core_type<tc>, window_params = [{transform_indices = @transform_0, window_bounds = array<i64: 1>}, {transform_indices = @transform_1, window_bounds = array<i64: 1, 4, 256>}, {transform_indices = @transform_2, window_bounds = array<i64: 1, 4, 256>}]} {
    %c0 = arith.constant 0 : index
    %c0_0 = arith.constant 0 : index
    %c0_1 = arith.constant 0 : index
    %0 = vector.load %arg2[%c0, %c0_0, %c0_1] : memref<1x4x256xf32, #tpu.memory_space<vmem>>, vector<1x4x256xf32>
    %1 = vector.shape_cast %0 : vector<1x4x256xf32> to vector<4x256xf32>
    %cst = arith.constant dense<0.000000e+00> : vector<4x4xf32>
    %2 = tpu.matmul %1, %1, %cst {dimension_numbers = #tpu.dot_dimension_numbers<[1], [1], [0], [0], [0, 0, 1, 0], [], []>} : vector<4x256xf32>, vector<4x256xf32>, vector<4x4xf32> -> vector<4x4xf32>
    %cst_2 = arith.constant dense<0xFF800000> : vector<4xf32>
    %3 = vector.multi_reduction <maximumf>, %2, %cst_2 [1] : vector<4x4xf32> to vector<4xf32>
    %4 = vector.shape_cast %3 : vector<4xf32> to vector<4x1xf32>
    %5 = vector.broadcast %4 : vector<4x1xf32> to vector<4x4xf32>
    %6 = arith.subf %5, %2 : vector<4x4xf32>
    %cst_3 = arith.constant dense<0xFF800000> : vector<4xf32>
    %7 = vector.multi_reduction <maximumf>, %6, %cst_3 [1] : vector<4x4xf32> to vector<4xf32>
    %8 = vector.shape_cast %7 : vector<4xf32> to vector<4x1xf32>
    %9 = vector.broadcast %8 : vector<4x1xf32> to vector<4x4xf32>
    %10 = arith.subf %6, %9 : vector<4x4xf32>
    %11 = math.exp %10 : vector<4x4xf32>
    %cst_4 = arith.constant dense<0.000000e+00> : vector<4xf32>
    %12 = vector.multi_reduction <add>, %11, %cst_4 [1] : vector<4x4xf32> to vector<4xf32>
    %13 = vector.shape_cast %12 : vector<4xf32> to vector<4x1xf32>
    %14 = vector.broadcast %13 : vector<4x1xf32> to vector<4x4xf32>
    %15 = arith.divf %11, %14 : vector<4x4xf32>
    %cst_5 = arith.constant dense<0.000000e+00> : vector<4x256xf32>
    %16 = tpu.matmul %15, %1, %cst_5 {dimension_numbers = #tpu.dot_dimension_numbers<[1], [0], [0], [1], [0, 0, 1, 1], [], []>} : vector<4x4xf32>, vector<4x256xf32>, vector<4x256xf32> -> vector<4x256xf32>
    %c0_6 = arith.constant 0 : index
    %17 = memref.load %arg1[%c0_6] : memref<1xf32, #tpu.memory_space<smem>>
    %18 = vector.broadcast %17 : f32 to vector<4x256xf32>
    %19 = arith.mulf %18, %16 : vector<4x256xf32>
    %20 = arith.addf %19, %1 : vector<4x256xf32>
    %c0_7 = arith.constant 0 : index
    %c0_8 = arith.constant 0 : index
    %c0_9 = arith.constant 0 : index
    %21 = vector.load %arg3[%c0_7, %c0_8, %c0_9] : memref<1x4x256xf32, #tpu.memory_space<vmem>>, vector<1x4x256xf32>
    %22 = vector.shape_cast %21 : vector<1x4x256xf32> to vector<4x256xf32>
    %23 = vector.shape_cast %20 : vector<4x256xf32> to vector<1x4x256xf32>
    tpu.vector_store %arg3[%c0_7, %c0_8, %c0_9], %23 {strides = array<i32>} : memref<1x4x256xf32, #tpu.memory_space<vmem>>, vector<1x4x256xf32>,
    return
  }
  func.func @transform_0(%arg0: i32) -> i32 {
    %c0_i32 = arith.constant 0 : i32
    %c0_i32_0 = arith.constant 0 : i32
    return %c0_i32 : i32
  }
  func.func @transform_1(%arg0: i32) -> (i32, i32, i32) {
    %c0_i32 = arith.constant 0 : i32
    %c0_i32_0 = arith.constant 0 : i32
    %c0_i32_1 = arith.constant 0 : i32
    return %arg0, %c0_i32, %c0_i32_0 : i32, i32, i32
  }
  func.func @transform_2(%arg0: i32) -> (i32, i32, i32) {
    %c0_i32 = arith.constant 0 : i32
    %c0_i32_0 = arith.constant 0 : i32
    %c0_i32_1 = arith.constant 0 : i32
    return %arg0, %c0_i32, %c0_i32_0 : i32, i32, i32
  }
}

</mosaic_0001>

<bundles_post_ra>
// kernel: tpu_custom_call.1
= control target key start
LH: loop header
LB: loop body
LE: loop exit
PB: predicated region body
PF: predicated region fallthrough
CT: control target
= control target key end

     0   :  { %s758_s0 = inlined_call_operand.<no memory space> [shape: f32[1], index: 0, kind: input, shape index: {}]   ;;  %s759_s1 = inlined_call_operand.hbm [shape: f32[2,4,256], index: 1, kind: input, shape index: {}]   ;;  %s760_s2 = inlined_call_operand.hbm [shape: f32[2,4,256], index: 2, kind: output, shape index: {}]  }
   0x1   :  { %7 = sst [smem:[#allocation2]] %s758_s0 }
   0x2   :  { %8 = vsyncpa [#allocation4], 0 }
   0x3   :  { %10 = vsyncpa [#allocation4 + $0x1], 0 }
   0x4   :  { %11 = vsyncpa [#allocation5], 0 }
   0x5   :  { %13 = vsyncpa [#allocation5 + $0x1], 0  ;;  %s613_s11 = smov 0   ;;  %s615_s12 = smov 0  }
   0x6   :  { %s617_s13 = smov 0   ;;  %s619_s14 = smov 0  }
   0x7 LB: > { %s634_s0 = sadd.s32 4294967295, %s590_s14   ;;  %s427_s15 = sadd.s32 4294967294, %s590_s14   ;;  %s590_s14 = sphi %s619_s14, %s777_s14   ;;  %s586_s13 = sphi %s617_s13, %s776_s13   ;;  %s582_s12 = sphi %s615_s12, %s775_s12   ;;  %s578_s11 = sphi %s613_s11, %s774_s11  }
   0x8   : > { %s638_s16 = sadd.s32 1, %s590_s14   ;;  %s47_s17 = sadd.s32 1, %s586_s13 }
   0x9   : > { %s44_s18 = ssub.s32 %s590_s14, %s638_s16  ;;  %p54_p0 = scmp.ne.s32.totalorder %s586_s13, %s582_s12 }
   0xa   : > { %p45_p1 = scmp.eq.s32.totalorder %s44_s18, 0  ;;  %p55_p2 = scmp.eq.s32.totalorder %s590_s14, 0 }
   0xb   : > { %p60_p3 = scmp.ne.s32.totalorder %s582_s12, %s578_s11  ;;  %p61_p4 = scmp.eq.s32.totalorder %s634_s0, 0 }
   0xc   : > { %s650_s19 = scalar_select %p45_p1, %s586_s13, %s47_s17  }
   0xd   : > { %p652_p5 = por %p55_p2, %p54_p0  ;;  %p656_p6 = por %p61_p4, %p60_p3 }
   0xe   : > { %p84_p7 = scmp.eq.s32.totalorder %s634_s0, 1  ;;  %p90_p8 = scmp.eq.s32.totalorder %s427_s15, 1 }
   0xf   : > { %s764_s21 = scalar_select %p656_p6, 1, 0 }
  0x10   : > { %p458_p10 = scmp.lt.s32.totalorder %s590_s14, 2  ;;  %p663_p11 = por %p84_p7, %p54_p0 }
  0x11   : > { %p667_p12 = por %p90_p8, %p60_p3  ;;  %s113_s24 = sand.u32 1, %s586_s13  }
  0x12   : > { %s765_s22 = scalar_select %p663_p11, 1, 0 }
  0x13   : > { %s766_s23 = scalar_select %p667_p12, 1, 0 }
  0x14   : > { %s444_s25 = sshll.u32 %s590_s14, 7  ;;  %s430_s26 = sshll.u32 %s113_s24, 3 }
  0x15   : > { %s676_s29 = scalar_lea.hbm %s759_s1, %s444_s25  ;;  %s117_s30 = scalar_lea.vmem [#allocation3], %s430_s26 }
  0x16   : > { %s125_s3 = sshll.u32 %s117_s30, 4  ;;  %p680_p13 = pnand %p458_p10, %p652_p5  ;;  %s684_s3 = int_to_ptr.vmem [resolvable:$true] %s125_s3 }
  0x17   : > { %s114_s5 = scalar_lea.sflag [#allocation4], %s113_s24  ;;  %s498_s6 = scalar_lea.hbm %s676_s29, 128 }
  0x18   : > { %p499_p2 = scmp.ne.s32.totalorder %s676_s29, %s498_s6  ;;  %p500_p3 = pneg %p680_p13 }
  0x19   : > { %s503_s9 = scalar_lea.hbm %s759_s1, 256  ;;  %p504_p5 = scmp.lt.s32.totalorder %s676_s29, %s759_s1 }
  0x1a   : > { %p501_p4 = pnand %p500_p3, %p499_p2  ;;  %p505_p8 = scmp.lt.s32.totalorder %s503_s9, %s498_s6 }
  0x1c   : > { %p502_p7 = pneg %p501_p4  ;;  %p506_p10 = por %p505_p8, %p504_p5 }
  0x1e   : > { %p507_p9 = pnand %p506_p10, %p502_p7 }
  0x20   : > { %510 = shalt.err (!%p507_p9)
}
  0x21   : > { %s511_s17 = scalar_lea.vmem %s684_s3, 128  ;;  %s592_s18 = smov [#allocation3]  }
  0x22   : > { %p512_p0 = scmp.ne.s32.totalorder %s684_s3, %s511_s17  ;;  %s516_s20 = sshll.u32 %s592_s18, 4  ;;  %s517_s20 = int_to_ptr.vmem [resolvable:$false] %s516_s20 }
  0x23   : > { %s518_s24 = scalar_lea.vmem %s517_s20, 256  ;;  %p519_p4 = scmp.lt.s32.totalorder %s684_s3, %s517_s20 }
  0x24   : > { %p514_p1 = pnand %p512_p0, %p500_p3  ;;  %p520_p12 = scmp.lt.s32.totalorder %s518_s24, %s511_s17 }
  0x26   : > { %p515_p2 = pneg %p514_p1  ;;  %p521_p11 = por %p520_p12, %p519_p4 }
  0x28   : > { %p522_p6 = pnand %p521_p11, %p515_p2 }
  0x2a   : > { %525 = shalt.err (!%p522_p6)
}
  0x2b   : > { %453 = dma.hbm_to_vmem [thread:$0]  (!%p680_p13), %s676_s29, 128, %s684_s3, %s114_s5  }
  0x2c   : > { %p768_p9 = scmp.lt.s32.totalorder %s590_s14, 3  ;;  %p769_p7 = scmp.ge.s32.totalorder %s590_s14, 1 }
  0x2e   : > { %p131_p0 = pnand %p769_p7, %p768_p9 }
  0x2f   : > { %s711_s25 = sand.u32 (!%p131_p0), 1, %s582_s12   ;;  %p770_p6 = scmp.ne.s32.totalorder (!%p131_p0), %s764_s21, 0 }
  0x30   : > { %134 = sbr.rel (%p131_p0) target bundleno = 921 (0x399), region = 28  ;;  %s434_s26 = sshll.u32 (!%p131_p0), %s711_s25, 3 }
  0x31   : > { %s137_s27 = scalar_lea.sflag (!%p131_p0), [#allocation4], %s711_s25  ;;  %s140_s28 = scalar_lea.vmem (!%p131_p0), [#allocation3], %s434_s26 }
  0x35   : > { %569 = dma.done.wait (%p770_p6), %s137_s27, 128  }
  0x36   : > { %571 = vsyncadd (%p770_p6), %s137_s27, 4294967168  ;;  %v161_v0 = vld [vmem:[%s140_s28] sm:$0xff]  ;;  %vm235_vm0 = vcmask 27648   ;;  %vm255_vm1 = vcmask 1043456   ;;  %v593_v13 = vmov 0.0   ;;  %vm251_vm2 = vcmask 31744  }
  0x37   : > { %v163_v1 = vcombine.high %v161_v0, %v161_v0  ;;  %324 = vmatprep.mubr.f32.mxu1 %v593_v13  ;;  %s331_s21 = sld [smem:[#allocation2]]  ;;  %s445_s29 = sshll.u32 %s634_s0, 7 }
  0x38   : > { %s160_s30 = scalar_lea.vmem [#allocation6], %s434_s26  ;;  %s355_s6 = scalar_lea.hbm %s760_s2, %s445_s29 }
  0x39   : > { %195 = vmatprep.subr.mxu0 %v163_v1  ;;  %229 = vmatprep.mubr.f32.mxu0 %v163_v1  ;;  %s357_s3 = sshll.u32 %s160_s30, 4  ;;  %s343_s7 = scalar_lea.sflag [#allocation5], %s711_s25  ;;  %s358_s3 = int_to_ptr.vmem [resolvable:$true] %s357_s3 }
  0x3a   : > { %196 = vmatpush1.xpose.msra.mxu0 %v161_v0  ;;  %436 = vmatprep.subr.msk.mxu1 %vm255_vm1, %v163_v1  ;;  %s526_s8 = scalar_lea.vmem %s358_s3, 128  ;;  %p771_p12 = scmp.ne.s32.totalorder %s765_s22, 0 }
  0x3b   : > { %437 = vmatpush1.msk.msra.mxu1 %vm255_vm1, %v161_v0  ;;  %p527_p11 = scmp.ne.s32.totalorder %s358_s3, %s526_s8  ;;  %s594_s9 = smov [#allocation6]  }
  0x3c   : > { %s530_s0 = sshll.u32 %s594_s9, 4  ;;  %s531_s0 = int_to_ptr.vmem [resolvable:$false] %s530_s0 }
  0x3d   : > { %230 = vmatmul.mubr.f32.vlgmr.msra.gmra.mxu0 %v161_v0  ;;  %v332_v17 = vstv %s331_s21  ;;  %p528_p13 = pnand %p527_p11, %p771_p12  ;;  %s532_s10 = scalar_lea.vmem %s531_s0, 256 }
  0x3e   : > { %p533_p3 = scmp.lt.s32.totalorder %s358_s3, %s531_s0  ;;  %p534_p5 = scmp.lt.s32.totalorder %s532_s10, %s526_s8 }
  0x3f   : > { %p529_p1 = pneg %p528_p13 }
  0x40   : > { %p535_p8 = por %p534_p5, %p533_p3 }
  0x42   : > { %p536_p10 = pnand %p535_p8, %p529_p1 }
  0xfd   : > { %v231_v2 = vpop.f32.mrf.mxu0 }
  0xfe   : > { %v236_v3 = vsel %vm235_vm0, %v231_v2, -inf }
  0xff   : > { %237 = vmax.xlane.f32.xlu0 %v236_v3  ;;  %v233_v4 = vpop.f32.mrf.mxu0 }
 0x188   : > { %v238_v5 = vpop.xlane.xlu0 %237 }
 0x189   : > { %v239_v6 = vsub.f32 %v238_v5, %v231_v2 }
 0x18b   : > { %v240_v7 = vsel %vm235_vm0, %v239_v6, -inf }
 0x18c   : > { %241 = vmax.xlane.f32.xlu0 %v240_v7 }
 0x215   : > { %v242_v8 = vpop.xlane.xlu0 %241 }
 0x216   : > { %v243_v9 = vsub.f32 %v239_v6, %v242_v8 }
 0x218   : > { %v244_v10 = vmul.f32 1.442695, %v243_v9 }
 0x21a   : > { %494 = vpow2.f32 %v244_v10 }
 0x227   : > { %v495_v11 = vpop.eup %494 }
 0x228   : > { %v246_v12 = vsel %vm235_vm0, %v495_v11, 0.0 }
 0x229   : > { %247 = vadd.xlane.f32.xlu1 %v246_v12 }
 0x2b2   : > { %v248_v14 = vpop.xlane.xlu1 %247 }
 0x2b3   : > { %496 = vrcp.f32 %v248_v14 }
 0x2c0   : > { %v497_v15 = vpop.eup %496 }
 0x2c1   : > { %v250_v16 = vmul.f32 %v497_v15, %v495_v11 }
 0x2c3   : > { %438 = vmatmul.mubr.msk.f32.vlgmr.msra.gmra.mxu1 %vm251_vm2, %v250_v16 }
 0x383   : > { %v326_v18 = vpop.f32.mrf.mxu1 }
 0x384   : > { %v333_v19 = vmul.f32 %v332_v17, %v326_v18 }
 0x385   : > { %v328_v20 = vpop.f32.mrf.mxu1 }
 0x386   : > { %v334_v21 = vmul.f32 %v332_v17, %v328_v20  ;;  %v335_v22 = vadd.f32 %v333_v19, %v161_v0 }
 0x388   : > { %v336_v23 = vadd.f32 %v334_v21, %v163_v1 }
 0x38a   : > { %v339_v24 = vcombine.low %v335_v22, %v336_v23 }
 0x38c   : > { %341 = vst [vmem:[%s160_s30] sm:$0xff] %v339_v24 }
 0x38d   : > { %539 = shalt.err (!%p536_p10)
}
 0x38e   : > { %s540_s15 = scalar_lea.hbm %s355_s6, 128  ;;  %s544_s20 = scalar_lea.hbm %s760_s2, 256 }
 0x38f   : > { %p541_p2 = scmp.ne.s32.totalorder %s355_s6, %s540_s15  ;;  %p545_p7 = scmp.lt.s32.totalorder %s355_s6, %s760_s2 }
 0x390   : > { %p546_p0 = scmp.lt.s32.totalorder %s544_s20, %s540_s15 }
 0x391   : > { %p542_p4 = pnand %p541_p2, %p771_p12 }
 0x392   : > { %p547_p6 = por %p546_p0, %p545_p7 }
 0x393   : > { %p543_p9 = pneg %p542_p4 }
 0x395   : > { %p548_p11 = pnand %p547_p6, %p543_p9 }
 0x397   : > { %551 = shalt.err (!%p548_p11)
}
 0x398   : > { %448 = dma.vmem_to_hbm [thread:$0]  (%p771_p12), %s358_s3, 128, %s355_s6, %s343_s7  }
 0x399 PF: > { %s369_s26 = sand.u32 1, %s578_s11   ;;  %p772_p13 = scmp.ne.s32.totalorder %s766_s23, 0 }
 0x39a   : > { %p773_p1 = scmp.ge.s32.totalorder %s590_s14, 2  ;;  %s370_s27 = scalar_lea.sflag [#allocation5], %s369_s26 }
 0x39c   : > { %p455_p3 = pnand %p773_p1, %p772_p13 }
 0x39e   : > { %p456_p5 = pneg %p455_p3 }
 0x3a0   : > { %573 = dma.done.wait (%p456_p5), %s370_s27, 128  }
 0x3a1   : > { %575 = vsyncadd (%p456_p5), %s370_s27, 4294967168  ;;  %p16_p8 = scmp.ge.s32.totalorder %s638_s16, 4   ;;  %s774_s11 = smov %s582_s12 }
 0x3a2   : > { %s775_s12 = smov %s586_s13  ;;  %s776_s13 = smov %s650_s19 }
 0x3a3   : > { %s777_s14 = smov %s638_s16  ;;  %18 = sbr.rel (!%p16_p8) target bundleno = 7 (0x7), region = 73 }
 0x3a8   :  { %375 = vsyncpa [#allocation4], 1 }
 0x3a9   :  { %377 = vsyncpa [#allocation4 + $0x1], 1 }
 0x3aa   :  { %378 = vsyncpa [#allocation5], 1 }
 0x3ab   :  { %380 = vsyncpa [#allocation5 + $0x1], 1 }

</bundles_post_ra>
